<compile_context>
chip_gen: v5e
topology: v5e:2x2
jax: 0.10.0
libtpu: 0.0.40
codegen_flags: <defaults>
</compile_context>

<pallas_src>
import functools
import math

import jax
import jax.numpy as jnp
from jax import lax
from jax.experimental import pallas as pl
from jax.experimental.pallas import tpu as pltpu

_TK_MAX = 512                  # sublane (kept-row) tile cap, multiple of 8
_TR_CAP = 4096                 # lane (reduced) tile cap, multiple of 128
_IN_BUDGET = 8 * 1024 * 1024   # bytes of double-buffered input tile


def _cdiv(a, b):
    return -(-a // b)


def _choose_tk(k):
    """Sublane tile: <= _TK_MAX, multiple of 8 (or == k); ~2 tiles for v7x."""
    if k > _TK_MAX:
        return _TK_MAX
    if k >= 256:
        # Split into two tiles so the parallel axis can shard across the two
        # v7x TensorCores even when k would fit a single tile.
        return min(k, ((_cdiv(k, 2) + 7) // 8) * 8)
    return k                   # single full-extent tile


def _choose_tr(r, tk, itemsize):
    """Lane tile: full extent if r <= 128, else a multiple of 128 sized so the
    double-buffered input tile stays within _IN_BUDGET."""
    if r <= 128:
        return r
    tr = _IN_BUDGET // (2 * max(1, tk) * max(1, itemsize))
    tr = min(tr, _TR_CAP, (r // 128) * 128)
    return max(128, (tr // 128) * 128)


def _make_index_map(axis_srcs):
    """axis_srcs[d] = grid position supplying dim d's block index (None -> 0)."""
    def index_map(*g):
        return tuple(0 if s is None else g[s] for s in axis_srcs)
    return index_map


def _any_or_kernel(x_ref, o_ref, acc_ref, *, red_grid_axes, nr, r_total, tr):
    """OR-reduce the lane axis (plus all `red_grid_axes` grid steps) of
    (tk, tr) blocks into o_ref[tk, 1] (int32 0/1)."""
    is_first = pl.program_id(red_grid_axes[0]) == 0
    is_last = (pl.program_id(red_grid_axes[0])
               == pl.num_programs(red_grid_axes[0]) - 1)
    for a in red_grid_axes[1:]:
        is_first = jnp.logical_and(is_first, pl.program_id(a) == 0)
        is_last = jnp.logical_and(
            is_last, pl.program_id(a) == pl.num_programs(a) - 1)

    @pl.when(is_first)
    def _init():
        acc_ref[...] = jnp.zeros_like(acc_ref)

    j = pl.program_id(red_grid_axes[-1])          # lane-tile step

    def _accumulate(mask_tail):
        nz = x_ref[...] != 0                      # bool: no int32 widening
        if mask_tail:
            # Only the final lane tile pays for the iota + compare + select.
            col = j * tr + lax.broadcasted_iota(jnp.int32, nz.shape, 1)
            nz = jnp.logical_and(nz, col < r_total)
        w = acc_ref.shape[-1]                     # min(tr, 128)
        m = nz[:, :w]
        for c in range(1, tr // 128):             # fold lane slices in bool
            m = jnp.logical_or(m, nz[:, c * 128:(c + 1) * 128])
        acc_ref[...] = jnp.maximum(acc_ref[...], m.astype(jnp.int32))

    if r_total % tr == 0:
        _accumulate(False)
    else:
        @pl.when(j < nr - 1)
        def _steady():
            _accumulate(False)

        @pl.when(j == nr - 1)
        def _tail():
            _accumulate(True)

    @pl.when(is_last)
    def _finalize():
        # One small cross-lane reduce (<=128 lanes) per kept tile.
        o_ref[...] = jnp.max(acc_ref[...], axis=-1, keepdims=True)


def _any_or_reduce(xm, lead_reduced):
    """OR-reduce `xm` over its last axis plus every leading axis flagged True
    in `lead_reduced` (len == xm.ndim - 2).  Axis -2 is kept (output rows).
    Returns int32 0/1 shaped like `xm` with reduced axes -> size 1."""
    m = xm.ndim
    shape = xm.shape
    k_rows, r_lanes = shape[-2], shape[-1]
    lead = tuple(range(m - 2))
    kept_lead = [a for a in lead if not lead_reduced[a]]
    red_lead = [a for a in lead if lead_reduced[a]]

    itemsize = jnp.dtype(xm.dtype).itemsize
    tk = _choose_tk(k_rows)
    tr = _choose_tr(r_lanes, tk, itemsize)
    nk = _cdiv(k_rows, tk)
    nr = _cdiv(r_lanes, tr)
    acc_w = min(tr, 128)

    # Grid: kept axes first (parallel, megacore-shardable), reduction axes
    # last (arbitrary) so the accumulator completes a full reduction sweep
    # before the output tile changes.
    grid = tuple([shape[a] for a in kept_lead] + [nk]
                 + [shape[a] for a in red_lead] + [nr])
    pos = {}
    p = 0
    for a in kept_lead:
        pos[a] = p
        p += 1
    k_pos = p
    p += 1
    for a in red_lead:
        pos[a] = p
        p += 1
    r_pos = p
    red_grid_axes = tuple(pos[a] for a in red_lead) + (r_pos,)

    in_spec = pl.BlockSpec(
        (None,) * len(lead) + (tk, tr),
        _make_index_map(tuple(pos[a] for a in lead) + (k_pos, r_pos)))
    out_shape = tuple(1 if lead_reduced[a] else shape[a] for a in lead) + (k_rows, 1)
    out_spec = pl.BlockSpec(
        (None,) * len(lead) + (tk, 1),
        _make_index_map(tuple(None if lead_reduced[a] else pos[a] for a in lead)
                        + (k_pos, None)))

    kernel = functools.partial(_any_or_kernel, red_grid_axes=red_grid_axes,
                               nr=nr, r_total=r_lanes, tr=tr)
    return pl.pallas_call(
        kernel,
        out_shape=jax.ShapeDtypeStruct(out_shape, jnp.int32),
        grid=grid,
        in_specs=[in_spec],
        out_specs=out_spec,
        scratch_shapes=[pltpu.VMEM((tk, acc_w), jnp.int32)],
        compiler_params=pltpu.CompilerParams(
            dimension_semantics=("parallel",) * (len(kept_lead) + 1)
            + ("arbitrary",) * (len(red_lead) + 1)),
    )(xm)


def pallas_any(x, dim=None, keepdim=False):
    """Forward pass of the Qualcomm `Any` module (returns bool)."""
    if dim is None:
        # torch: flatten, reduce dim 0, then `!= zeros(1)` broadcasts to (1,).
        flat = x.reshape(-1)                             # free
        n = flat.shape[0]
        kp = 1
        for cand in (512, 256, 128, 64, 32, 16, 8):
            if n % cand == 0 and n // cand >= 128:
                kp = cand
                break
        part = _any_or_reduce(flat.reshape(kp, n // kp), ())   # free reshape
        return (jnp.max(part) != 0).reshape(1)

    dims = (dim,) if isinstance(dim, int) else tuple(dim)
    ndim = x.ndim
    dims = tuple(sorted({d % ndim for d in dims}))
    kept = tuple(i for i in range(ndim) if i not in dims)

    if (ndim - 1) in dims:
        # No-transpose path: merge contiguous same-kind axis runs (free
        # reshape); non-trailing runs become size-1 grid axes in the kernel.
        groups = []                                      # [is_reduced, size]
        for i in range(ndim):
            red = i in dims
            if groups and groups[-1][0] == red:
                groups[-1][1] *= x.shape[i]
            else:
                groups.append([red, x.shape[i]])
        if len(groups) == 1:                             # every axis reduced
            groups.insert(0, [False, 1])
        merged = tuple(g[1] for g in groups)
        lead_reduced = tuple(g[0] for g in groups[:-2])
        part = _any_or_reduce(x.reshape(merged), lead_reduced)
    else:
        # All reduced axes are non-trailing (lane axis kept).
        # TODO(synk): fold the reduced axes over sublanes in-kernel instead of
        # materializing this transpose (sublane-reduced kernel variant).
        xt = jnp.transpose(x, kept + dims)
        K = math.prod(x.shape[i] for i in kept)
        R = math.prod(x.shape[i] for i in dims)
        part = _any_or_reduce(xt.reshape(K, R), ())

    out = part != 0                                      # bool
    if keepdim:
        target = tuple(1 if i in dims else x.shape[i] for i in range(ndim))
    else:
        target = tuple(x.shape[i] for i in kept)
    out = out.reshape(target)
    if out.ndim == 0:
        # torch.not_equal(0-d, zeros(1)) broadcasts to shape (1,).
        out = out.reshape(1)
    return out


if __name__ == "__main__":
    key = jax.random.PRNGKey(0)
    k1, k2, k3, k4, k5 = jax.random.split(key, 5)

    # Primary example: small NCHW-like input, sparse so `any` is non-trivial,
    # reduced over interleaved dims (exercises the no-transpose N-D path).
    mask = jax.random.bernoulli(k1, p=0.1, shape=(2, 4, 16, 16))
    vals = jax.random.normal(k2, (2, 4, 16, 16), dtype=jnp.float32)
    x = jnp.where(mask, vals, 0.0)
    x = x.at[0, :, 3, :].set(0.0)      # guaranteed False output entries
    x = x.at[1, :, 5, :].set(0.0)
    x = x.at[0, 2, 7, 9].set(1.0)      # guaranteed True output entry

    y = jax.block_until_ready(pallas_any(x, dim=(1, 3), keepdim=False))
    ref = jnp.any(x != 0, axis=(1, 3))
    assert y.shape == ref.shape and y.dtype == jnp.bool_, (y.shape, y.dtype)
    assert bool(jnp.array_equal(y, ref)), "mismatch vs reference (dim=(1,3))"

    yk = jax.block_until_ready(pallas_any(x, dim=[1, 3], keepdim=True))
    refk = jnp.any(x != 0, axis=(1, 3), keepdims=True)
    assert yk.shape == refk.shape and bool(jnp.array_equal(yk, refk))

    # dim=None (flatten) path: shape (1,) per torch broadcasting vs zeros(1).
    yn = jax.block_until_ready(pallas_any(x, dim=None, keepdim=False))
    assert yn.shape == (1,) and bool(yn[0]) == bool(jnp.any(x != 0))

    # Trailing-contiguous reduced dims + multiple lane tiles + masked tail.
    m2 = jax.random.bernoulli(k3, p=0.0005, shape=(15, 17, 260))
    v2 = jax.random.normal(k4, (15, 17, 260), dtype=jnp.float32)
    x2 = jnp.where(m2, v2, 0.0)
    x2 = x2.at[3].set(0.0)             # guaranteed False row
    x2 = x2.at[0, 5, 7].set(1.0)       # guaranteed True row
    y2 = jax.block_until_ready(pallas_any(x2, dim=[1, 2], keepdim=False))
    assert bool(jnp.array_equal(y2, jnp.any(x2 != 0, axis=(1, 2))))

    # bf16 input, single trailing reduced dim (multi-slice lane folding).
    m3 = jax.random.bernoulli(k5, p=0.01, shape=(8, 384))
    x3 = jnp.where(m3, 1.0, 0.0).astype(jnp.bfloat16)
    x3 = x3.at[2, :].set(0.0)
    x3 = x3.at[5, 100].set(1.0)
    y3 = jax.block_until_ready(pallas_any(x3, dim=1, keepdim=False))
    assert bool(jnp.array_equal(y3, jnp.any(x3 != 0, axis=1)))

    # Last axis kept -> transpose fallback path.
    x4 = jnp.zeros((4, 6, 8), jnp.float32).at[1, 3, 2].set(2.0).at[3, 0, 7].set(-1.0)
    y4 = jax.block_until_ready(pallas_any(x4, dim=1, keepdim=False))
    assert bool(jnp.array_equal(y4, jnp.any(x4 != 0, axis=1)))

    print("KERNEL_OK")
</pallas_src>

<mosaic_0001>
module attributes {stable_mosaic.version = 11 : i64} {
  func.func @_any_or_kernel(%arg0: i32, %arg1: i32, %arg2: i32, %arg3: i32, %arg4: memref<1x1x16x16xf32, #tpu.memory_space<vmem>>, %arg5: memref<1x1x16x1xi32, #tpu.memory_space<vmem>>, %arg6: memref<16x16xi32, #tpu.memory_space<vmem>>) attributes {dimension_semantics = [#tpu.dimension_semantics<parallel>, #tpu.dimension_semantics<parallel>, #tpu.dimension_semantics<arbitrary>, #tpu.dimension_semantics<arbitrary>], iteration_bounds = array<i64: 2, 1, 4, 1>, scalar_prefetch = 0 : i64, scratch_operands = 1 : i64, tpu.core_type = #tpu.core_type<tc>, window_params = [{transform_indices = @transform_0, window_bounds = array<i64: 1, 1, 16, 16>}, {transform_indices = @transform_1, window_bounds = array<i64: 1, 1, 16, 1>}]} {
    %c0_i32 = arith.constant 0 : i32
    %0 = arith.cmpi eq, %arg2, %c0_i32 : i32
    %c3_i32 = arith.constant 3 : i32
    %1 = arith.cmpi eq, %arg2, %c3_i32 : i32
    %c0_i32_0 = arith.constant 0 : i32
    %2 = arith.cmpi eq, %arg3, %c0_i32_0 : i32
    %3 = arith.andi %0, %2 : i1
    %c0_i32_1 = arith.constant 0 : i32
    %4 = arith.cmpi eq, %arg3, %c0_i32_1 : i32
    %5 = arith.andi %1, %4 : i1
    %6 = arith.extui %3 : i1 to i32
    %c0_i32_2 = arith.constant 0 : i32
    %7 = arith.cmpi ne, %6, %c0_i32_2 : i32
    scf.if %7 {
      %c0_i32_11 = arith.constant 0 : i32
      %18 = vector.broadcast %c0_i32_11 : i32 to vector<16x16xi32>
      %c0_12 = arith.constant 0 : index
      %c0_13 = arith.constant 0 : index
      %19 = vector.load %arg6[%c0_12, %c0_13] : memref<16x16xi32, #tpu.memory_space<vmem>>, vector<16x16xi32>
      tpu.vector_store %arg6[%c0_12, %c0_13], %18 {strides = array<i32>} : memref<16x16xi32, #tpu.memory_space<vmem>>, vector<16x16xi32>,
    } else {
    }
    %c0 = arith.constant 0 : index
    %c0_3 = arith.constant 0 : index
    %c0_4 = arith.constant 0 : index
    %c0_5 = arith.constant 0 : index
    %8 = vector.load %arg4[%c0, %c0_3, %c0_4, %c0_5] : memref<1x1x16x16xf32, #tpu.memory_space<vmem>>, vector<1x1x16x16xf32>
    %9 = vector.shape_cast %8 : vector<1x1x16x16xf32> to vector<16x16xf32>
    %cst = arith.constant 0.000000e+00 : f32
    %10 = vector.broadcast %cst : f32 to vector<16x16xf32>
    %11 = arith.cmpf one, %9, %10 : vector<16x16xf32>
    %c0_6 = arith.constant 0 : index
    %c0_7 = arith.constant 0 : index
    %12 = vector.load %arg6[%c0_6, %c0_7] : memref<16x16xi32, #tpu.memory_space<vmem>>, vector<16x16xi32>
    %13 = arith.extui %11 : vector<16x16xi1> to vector<16x16xi32>
    %14 = arith.maxsi %12, %13 : vector<16x16xi32>
    %c0_8 = arith.constant 0 : index
    %c0_9 = arith.constant 0 : index
    %15 = vector.load %arg6[%c0_8, %c0_9] : memref<16x16xi32, #tpu.memory_space<vmem>>, vector<16x16xi32>
    tpu.vector_store %arg6[%c0_8, %c0_9], %14 {strides = array<i32>} : memref<16x16xi32, #tpu.memory_space<vmem>>, vector<16x16xi32>,
    %16 = arith.extui %5 : i1 to i32
    %c0_i32_10 = arith.constant 0 : i32
    %17 = arith.cmpi ne, %16, %c0_i32_10 : i32
    scf.if %17 {
      %c0_11 = arith.constant 0 : index
      %c0_12 = arith.constant 0 : index
      %18 = vector.load %arg6[%c0_11, %c0_12] : memref<16x16xi32, #tpu.memory_space<vmem>>, vector<16x16xi32>
      %cst_13 = arith.constant dense<-2147483648> : vector<16xi32>
      %19 = vector.multi_reduction <maxsi>, %18, %cst_13 [1] : vector<16x16xi32> to vector<16xi32>
      %20 = vector.shape_cast %19 : vector<16xi32> to vector<16x1xi32>
      %c0_14 = arith.constant 0 : index
      %c0_15 = arith.constant 0 : index
      %c0_16 = arith.constant 0 : index
      %c0_17 = arith.constant 0 : index
      %21 = vector.load %arg5[%c0_14, %c0_15, %c0_16, %c0_17] : memref<1x1x16x1xi32, #tpu.memory_space<vmem>>, vector<1x1x16x1xi32>
      %22 = vector.shape_cast %21 : vector<1x1x16x1xi32> to vector<16x1xi32>
      %23 = vector.shape_cast %20 : vector<16x1xi32> to vector<1x1x16x1xi32>
      tpu.vector_store %arg5[%c0_14, %c0_15, %c0_16, %c0_17], %23 {strides = array<i32>} : memref<1x1x16x1xi32, #tpu.memory_space<vmem>>, vector<1x1x16x1xi32>,
    } else {
    }
    return
  }
  func.func @transform_0(%arg0: i32, %arg1: i32, %arg2: i32, %arg3: i32) -> (i32, i32, i32, i32) {
    %c0_i32 = arith.constant 0 : i32
    return %arg0, %arg2, %arg1, %arg3 : i32, i32, i32, i32
  }
  func.func @transform_1(%arg0: i32, %arg1: i32, %arg2: i32, %arg3: i32) -> (i32, i32, i32, i32) {
    %c0_i32 = arith.constant 0 : i32
    %c0_i32_0 = arith.constant 0 : i32
    %c0_i32_1 = arith.constant 0 : i32
    return %arg0, %c0_i32, %arg1, %c0_i32_0 : i32, i32, i32, i32
  }
}

</mosaic_0001>

<bundles_post_ra>
// kernel: tpu_custom_call.1
= control target key start
LH: loop header
LB: loop body
LE: loop exit
PB: predicated region body
PF: predicated region fallthrough
CT: control target
= control target key end

     0   :  { %6 = vsyncpa [#allocation4], 0  ;;  %s686_s0 = inlined_call_operand.hbm [shape: f32[2,4,16,16], index: 0, kind: input, shape index: {}]   ;;  %s687_s1 = inlined_call_operand.vmem [shape: s32[2,1,16,1], index: 1, kind: output, shape index: {}]  }
   0x1   :  { %8 = vsyncpa [#allocation4 + $0x1], 0  ;;  %s565_s6 = smov 0   ;;  %s567_s7 = smov 0  }
   0x2   :  { %s569_s8 = smov 0   ;;  %s571_s9 = smov 0  }
   0x3   :  { %s573_s10 = smov 0   ;;  %s575_s11 = smov 0  }
   0x4   :  { %s577_s12 = smov 0   ;;  %s579_s13 = smov 0  }
   0x5 LB: > { %s359_s14 = sadd.s32 4294967295, %s549_s13   ;;  %s32_s15 = sadd.s32 1, %s541_s11  ;;  %s549_s13 = sphi %s579_s13, %s14_s13   ;;  %s545_s12 = sphi %s577_s12, %s696_s12   ;;  %s541_s11 = sphi %s575_s11, %s695_s11   ;;  %s537_s10 = sphi %s573_s10, %s694_s10   ;;  %s533_s9 = sphi %s571_s9, %s693_s9   ;;  %s529_s8 = sphi %s569_s8, %s692_s8   ;;  %s525_s7 = sphi %s567_s7, %s691_s7   ;;  %s521_s6 = sphi %s565_s6, %s690_s6  }
   0x6   : > { %p34_p0 = scmp.ge.s32.totalorder %s32_s15, 4  ;;  %s40_s16 = sadd.s32 1, %s545_s12 }
   0x7   : > { %s53_s17 = sadd.s32 1, %s529_s8  ;;  %p60_p1 = scmp.ne.s32.totalorder %s529_s8, %s525_s7 }
   0x8   : > { %s698_s15 = smov (%p34_p0, %s32_s15), 0  ;;  %s700_s16 = smov (!%p34_p0, %s40_s16), %s545_s12 }
   0x9   : > { %s45_s18 = ssub.s32 %s541_s11, %s698_s15  ;;  %p61_p2 = scmp.eq.s32.totalorder %s549_s13, 0 }
   0xa   : > { %p42_p3 = scmp.ge.s32.totalorder %s700_s16, 2  ;;  %p66_p4 = scmp.ne.s32.totalorder %s525_s7, %s521_s6 }
   0xb   : > { %p616_p5 = por %p61_p2, %p60_p1  ;;  %p67_p6 = scmp.eq.s32.totalorder %s359_s14, 0 }
   0xc   : > { %s702_s16 = smov (%p42_p3, %s700_s16), 0  ;;  %p384_p8 = scmp.lt.s32.totalorder %s549_s13, 8 }
   0xd   : > { %p622_p7 = por %p67_p6, %p66_p4  ;;  %s44_s21 = ssub.s32 %s545_s12, %s702_s16 }
   0xe   : > { %s46_s22 = sor.u32 %s45_s18, %s44_s21  ;;  %s118_s23 = sand.u32 1, %s529_s8  }
   0xf   : > { %p51_p9 = scmp.eq.s32.totalorder %s46_s22, 0  ;;  %s363_s24 = sshll.u32 %s118_s23, 4 }
  0x10   : > { %s364_s25 = sshll.u32 %s541_s11, 1  ;;  %s365_s27 = sshll.u32 %s545_s12, 3 }
  0x11   : > { %s632_s26 = scalar_select %p51_p9, %s529_s8, %s53_s17  }
  0x12   : > { %s130_s28 = sadd.s32 %s365_s27, %s364_s25  ;;  %s122_s29 = scalar_lea.vmem [#allocation3], %s363_s24 }
  0x13   : > { %s135_s30 = sshll.u32 %s122_s29, 4  ;;  %s366_s2 = sshll.u32 %s130_s28, 3  ;;  %s136_s30 = int_to_ptr.vmem [resolvable:$true] %s135_s30 }
  0x14   : > { %s132_s5 = scalar_lea.hbm %s686_s0, %s366_s2  ;;  %p381_p10 = pnand %p384_p8, %p616_p5 }
  0x15   : > { %s133_s6 = sshll.u32 %s132_s5, 4  ;;  %p367_p11 = scmp.ge.s32.totalorder %s549_s13, 1  ;;  %s134_s6 = int_to_ptr.hbm [resolvable:$true] %s133_s6 }
  0x16   : > { %s119_s14 = scalar_lea.sflag [#allocation4], %s118_s23  ;;  %s551_s17 = smov 128  }
  0x17   : > { %s552_s18 = smov 8   ;;  %p143_p12 = scmp.lt.s32.totalorder %s549_s13, 9 }
  0x18   : > { %383 = dma.hbm_to_vmem [thread:$0]  (!%p381_p10), %s134_s6, 256, %s136_s30, %s119_s14, %s551_s17, %s551_s17, %s552_s18  }
  0x19   : > { %p144_p13 = pnand %p367_p11, %p143_p12 }
  0x1a   : > { %s149_s21 = sand.u32 (!%p144_p13), 1, %s525_s7  }
  0x1b   : > { %147 = sbr.rel (%p144_p13) target bundleno = 305 (0x131), region = 24  ;;  %s368_s22 = sshll.u32 (!%p144_p13), %s149_s21, 4 }
  0x1c   : > { %s150_s24 = scalar_lea.sflag (!%p144_p13), [#allocation4], %s149_s21  ;;  %s153_s25 = scalar_lea.vmem (!%p144_p13), [#allocation3], %s368_s22 }
  0x20   : > { %516 = dma.done.wait (%p622_p7), %s150_s24, 256  }
  0x21   : > { %518 = vsyncadd (%p622_p7), %s150_s24, 4294967040  ;;  %p179_p0 = scmp.lt.s32.totalorder %s537_s10, 1  ;;  %p188_p1 = scmp.eq.s32.totalorder %s533_s9, 0 }
  0x22   : > { %p189_p2 = scmp.eq.s32.totalorder %s533_s9, 3  ;;  %vm197_vm0 = vcmask (%p188_p1), 130048   ;;  %v553_v0 = vmov (%p188_p1), 0  }
  0x23   : > { %s704_s10 = smov (!%p179_p0, %s537_s10), 1  ;;  %196 = sbr.rel (!%p188_p1) target bundleno = 40 (0x28), region = 32  ;;  %198 = vst.msk [vmem:[#allocation2] sm:$0xff] (%p188_p1), %vm197_vm0, %v553_v0 }
  0x24   : > { %s375_s19 = sshll.u32 %s704_s10, 4  ;;  %199 = vst.msk [vmem:[#allocation2 + $0x8] sm:$0xff] (%p188_p1), %vm197_vm0, %v553_v0 }
  0x25   : > { %s656_s28 = scalar_lea.vmem %s687_s1, %s375_s19 }
  0x28 PF: > { %v200_v1 = vld [vmem:[%s153_s25] sm:$0xff]  ;;  %v201_v3 = vld [vmem:[%s153_s25 + $0x8] sm:$0xff]  ;;  %v554_v5 = vmov 0   ;;  %vm212_vm3 = vcmask 130048   ;;  %vm249_vm8 = vcmask (%p189_p2), 7168  }
  0x29   : > { %vm202_vm1 = vcmp.ne.f32.partialorder %v200_v1, 0.0  ;;  %vm203_vm2 = vcmp.ne.f32.partialorder %v201_v3, 0.0 }
  0x2a   : > { %v204_v2 = vld [vmem:[#allocation2] sm:$0xff]  ;;  %v206_v6 = vsel %vm202_vm1, 1, %v554_v5  ;;  %v207_v7 = vsel %vm203_vm2, 1, %v554_v5  ;;  %216 = sbr.rel (!%p189_p2) target bundleno = 305 (0x131), region = 36 }
  0x2b   : > { %v205_v4 = vld [vmem:[#allocation2 + $0x8] sm:$0xff]  ;;  %vm208_vm4 = vcmp.gt.s32.totalorder %v204_v2, %v206_v6 }
  0x2c   : > { %vm210_vm5 = vcmp.gt.s32.totalorder %v205_v4, %v207_v7  ;;  %v209_v8 = vsel %vm208_vm4, %v204_v2, %v206_v6 }
  0x2d   : > { %v211_v9 = vsel %vm210_vm5, %v205_v4, %v207_v7  ;;  %213 = vst.msk [vmem:[#allocation2] sm:$0xff] %vm212_vm3, %v209_v8 }
  0x2e   : > { %214 = vst.msk [vmem:[#allocation2 + $0x8] sm:$0xff] %vm212_vm3, %v211_v9 }
  0x34   : > { %v217_v10 = vld [vmem:[#allocation2] sm:$0xff] }
  0x35   : > { %v218_v11 = vld [vmem:[#allocation2 + $0x8] sm:$0xff]  ;;  %v219_v12 = vsel %vm212_vm3, %v217_v10, 2147483648 }
  0x36   : > { %v221_v13 = vshra.s32 %v219_v12, 16  ;;  %v234_v14 = vsel %vm212_vm3, %v218_v11, 2147483648  ;;  %v220_v18 = vand.u32 65535, %v219_v12 }
  0x37   : > { %v236_v16 = vshra.s32 %v234_v14, 16  ;;  %v235_v22 = vand.u32 65535, %v234_v14 }
  0x38   : > { %v223_v15 = vcvt.s32.f32 %v221_v13  ;;  %v222_v19 = vcvt.s32.f32 %v220_v18 }
  0x39   : > { %v238_v17 = vcvt.s32.f32 %v236_v16  ;;  %v237_v23 = vcvt.s32.f32 %v235_v22 }
  0x3a   : > { %224 = vmax.xlane.f32.xlu0 %v223_v15 }
  0x42   : > { %239 = vmax.xlane.f32.xlu0 %v238_v17 }
  0xad   : > { %v225_v20 = vpop.xlane.xlu0 %224 }
  0xae   : > { %vm226_vm6 = vcmp.eq.f32.partialorder %v223_v15, %v225_v20  ;;  %v231_v26 = vcvt.f32.s32 %v225_v20 }
  0xaf   : > { %v227_v21 = vsel %vm226_vm6, %v222_v19, -inf }
  0xb0   : > { %228 = vmax.xlane.f32.xlu1 %v227_v21  ;;  %v232_v28 = vshll.u32 %v231_v26, 16 }
  0xb5   : > { %v240_v24 = vpop.xlane.xlu0 %239 }
  0xb6   : > { %vm241_vm7 = vcmp.eq.f32.partialorder %v238_v17, %v240_v24  ;;  %v246_v31 = vcvt.f32.s32 %v240_v24 }
  0xb7   : > { %v242_v25 = vsel %vm241_vm7, %v237_v23, -inf }
  0xb8   : > { %243 = vmax.xlane.f32.xlu1 %v242_v25  ;;  %v247_v33 = vshll.u32 %v246_v31, 16 }
 0x123   : > { %v229_v27 = vpop.xlane.xlu1 %228 }
 0x124   : > { %v230_v29 = vcvt.f32.s32 %v229_v27 }
 0x126   : > { %v233_v30 = vadd.s32 %v232_v28, %v230_v29 }
 0x128   : > { %250 = vst.msk [vmem:[%s656_s28] sm:$0xff] %vm249_vm8, %v233_v30 }
 0x12b   : > { %v244_v32 = vpop.xlane.xlu1 %243 }
 0x12c   : > { %v245_v34 = vcvt.f32.s32 %v244_v32 }
 0x12e   : > { %v248_v35 = vadd.s32 %v247_v33, %v245_v34 }
 0x130   : > { %251 = vst.msk [vmem:[%s656_s28 + $0x8] sm:$0xff] %vm249_vm8, %v248_v35 }
 0x131 PF: > { %s14_s13 = sadd.s32 1, %s549_s13   ;;  %s690_s6 = smov %s525_s7 }
 0x132   : > { %p11_p3 = scmp.ge.s32.totalorder %s14_s13, 10   ;;  %s691_s7 = smov %s529_s8 }
 0x133   : > { %s692_s8 = smov %s632_s26  ;;  %s693_s9 = smov %s541_s11 }
 0x134   : > { %s694_s10 = smov %s545_s12  ;;  %s695_s11 = smov %s698_s15 }
 0x135   : > { %s696_s12 = smov %s702_s16  ;;  %13 = sbr.rel (!%p11_p3) target bundleno = 5 (0x5), region = 72 }
 0x13a   :  { %282 = vsyncpa [#allocation4], 1 }
 0x13b   :  { %284 = vsyncpa [#allocation4 + $0x1], 1 }

</bundles_post_ra>
